<compile_context>
chip_gen: v5e
topology: v5e:2x2
jax: 0.10.0
libtpu: 0.0.40
codegen_flags: <defaults>
</compile_context>

<pallas_src>
import jax
import jax.numpy as jnp
from jax.experimental import pallas as pl
from jax.experimental.pallas import tpu as pltpu


def _outconv_kernel(x_ref, w_ref, b_ref, o_ref):
    """One lane-dense 1x1-conv tile.

    x_ref: (1, Cin, T)  VMEM   -- spatial dim T sits in lanes
    w_ref: (Cout, Cin)  SMEM   -- tiny scalar table
    b_ref: (Cout,)      SMEM
    o_ref: (1, Cout, T) VMEM
    """
    cin = x_ref.shape[1]
    cout = o_ref.shape[1]
    # Fully unrolled VPU formulation: Cout x Cin scalar-broadcast multiply-adds
    # over lane-dense (1, T) rows; each output row is stored as soon as it is
    # finished to keep live ranges short.
    for co in range(cout):
        acc = x_ref[0, 0:1, :] * w_ref[co, 0]
        for ci in range(1, cin):
            acc = acc + x_ref[0, ci:ci + 1, :] * w_ref[co, ci]
        o_ref[0, co:co + 1, :] = (acc + b_ref[co]).astype(o_ref.dtype)


def _pick_spatial_tile(hw, max_tile):
    """Largest lane tile that divides hw, is a multiple of 128 and <= max_tile.

    Falls back to the full spatial extent (block dim == full array dim is
    always legal) when hw is small or not 128-aligned, so no padding copy is
    ever materialized.
    """
    if hw % 128 != 0 or hw <= max_tile:
        return hw
    t = (min(max_tile, hw) // 128) * 128
    while hw % t != 0:  # terminates: 128 divides hw
        t -= 128
    return t


def outconv_pallas(x_nchw, weight, bias, *, max_tile_hw=16384):
    """1x1 conv (NCHW in / NCHW out) via a lane-dense Pallas kernel.

    x_nchw: (N, Cin, H, W) float32
    weight: (Cout, Cin, 1, 1) float32   (PyTorch Conv2d weight layout)
    bias:   (Cout,) float32
    """
    N, Cin, H, W = x_nchw.shape
    Cout = weight.shape[0]
    HW = H * W

    # Pure reshapes — no transpose, no padded copy, no extra HBM pass.
    x3 = x_nchw.reshape(N, Cin, HW)
    w_mat = weight.reshape(Cout, Cin).astype(jnp.float32)
    b_vec = bias.reshape(Cout).astype(jnp.float32)

    T = _pick_spatial_tile(HW, max_tile_hw)
    grid = (N, HW // T)

    out3 = pl.pallas_call(
        _outconv_kernel,
        out_shape=jax.ShapeDtypeStruct((N, Cout, HW), x_nchw.dtype),
        grid_spec=pltpu.PrefetchScalarGridSpec(
            num_scalar_prefetch=0,
            grid=grid,
            in_specs=[
                # Lane-dense activation tile: full channel dim, T spatial lanes.
                pl.BlockSpec((1, Cin, T), lambda n, j: (n, 0, j)),
                # Tiny weight / bias tables resident in SMEM for scalar reads.
                pl.BlockSpec(memory_space=pltpu.MemorySpace.SMEM),
                pl.BlockSpec(memory_space=pltpu.MemorySpace.SMEM),
            ],
            out_specs=pl.BlockSpec((1, Cout, T), lambda n, j: (n, 0, j)),
        ),
        compiler_params=pltpu.CompilerParams(
            # Both axes are independent -> megacore sharding on v7x; harmless
            # on single-TC v5e/v6e.
            dimension_semantics=("parallel", "parallel"),
        ),
    )(x3, w_mat, b_vec)

    return out3.reshape(N, Cout, H, W)


if __name__ == "__main__":
    key = jax.random.PRNGKey(0)
    k_x, k_w, k_b = jax.random.split(key, 3)

    N, Cin, H, W = 2, 4, 16, 16
    Cout = 3

    x = jax.random.normal(k_x, (N, Cin, H, W), dtype=jnp.float32)
    # Deterministic "Conv2d(in_ch, out_ch, 1)" parameters (synthetic init).
    weight = jax.random.normal(k_w, (Cout, Cin, 1, 1), dtype=jnp.float32) * 0.1
    bias = jax.random.normal(k_b, (Cout,), dtype=jnp.float32) * 0.1

    y = outconv_pallas(x, weight, bias)
    y = jax.block_until_ready(y)

    # Reference check against plain-JAX einsum (same math as torch conv 1x1).
    y_ref = (
        jnp.einsum("nchw,oc->nohw", x, weight.reshape(Cout, Cin))
        + bias[None, :, None, None]
    )
    assert y.shape == (N, Cout, H, W)
    assert jnp.allclose(y, y_ref, atol=1e-5, rtol=1e-5)

    print("KERNEL_OK")
</pallas_src>

<mosaic_0001>
module attributes {stable_mosaic.version = 11 : i64} {
  func.func @_outconv_kernel(%arg0: i32, %arg1: i32, %arg2: memref<1x4x256xf32, #tpu.memory_space<vmem>>, %arg3: memref<3x4xf32, #tpu.memory_space<smem>>, %arg4: memref<3xf32, #tpu.memory_space<smem>>, %arg5: memref<1x3x256xf32, #tpu.memory_space<vmem>>) attributes {dimension_semantics = [#tpu.dimension_semantics<parallel>, #tpu.dimension_semantics<parallel>], iteration_bounds = array<i64: 2, 1>, scalar_prefetch = 0 : i64, scratch_operands = 0 : i64, tpu.core_type = #tpu.core_type<tc>, window_params = [{transform_indices = @transform_0, window_bounds = array<i64: 1, 4, 256>}, {transform_indices = @transform_1, window_bounds = array<i64: 3, 4>}, {transform_indices = @transform_2, window_bounds = array<i64: 3>}, {transform_indices = @transform_3, window_bounds = array<i64: 1, 3, 256>}]} {
    %c0 = arith.constant 0 : index
    %c0_0 = arith.constant 0 : index
    %c0_1 = arith.constant 0 : index
    %0 = vector.load %arg2[%c0, %c0_0, %c0_1] : memref<1x4x256xf32, #tpu.memory_space<vmem>>, vector<1x1x256xf32>
    %1 = vector.shape_cast %0 : vector<1x1x256xf32> to vector<1x256xf32>
    %c0_2 = arith.constant 0 : index
    %c0_3 = arith.constant 0 : index
    %2 = memref.load %arg3[%c0_2, %c0_3] : memref<3x4xf32, #tpu.memory_space<smem>>
    %3 = vector.broadcast %2 : f32 to vector<1x256xf32>
    %4 = arith.mulf %1, %3 : vector<1x256xf32>
    %c0_4 = arith.constant 0 : index
    %c1 = arith.constant 1 : index
    %c0_5 = arith.constant 0 : index
    %5 = vector.load %arg2[%c0_4, %c1, %c0_5] : memref<1x4x256xf32, #tpu.memory_space<vmem>>, vector<1x1x256xf32>
    %6 = vector.shape_cast %5 : vector<1x1x256xf32> to vector<1x256xf32>
    %c0_6 = arith.constant 0 : index
    %c1_7 = arith.constant 1 : index
    %7 = memref.load %arg3[%c0_6, %c1_7] : memref<3x4xf32, #tpu.memory_space<smem>>
    %8 = vector.broadcast %7 : f32 to vector<1x256xf32>
    %9 = arith.mulf %6, %8 : vector<1x256xf32>
    %10 = arith.addf %4, %9 : vector<1x256xf32>
    %c0_8 = arith.constant 0 : index
    %c2 = arith.constant 2 : index
    %c0_9 = arith.constant 0 : index
    %11 = vector.load %arg2[%c0_8, %c2, %c0_9] : memref<1x4x256xf32, #tpu.memory_space<vmem>>, vector<1x1x256xf32>
    %12 = vector.shape_cast %11 : vector<1x1x256xf32> to vector<1x256xf32>
    %c0_10 = arith.constant 0 : index
    %c2_11 = arith.constant 2 : index
    %13 = memref.load %arg3[%c0_10, %c2_11] : memref<3x4xf32, #tpu.memory_space<smem>>
    %14 = vector.broadcast %13 : f32 to vector<1x256xf32>
    %15 = arith.mulf %12, %14 : vector<1x256xf32>
    %16 = arith.addf %10, %15 : vector<1x256xf32>
    %c0_12 = arith.constant 0 : index
    %c3 = arith.constant 3 : index
    %c0_13 = arith.constant 0 : index
    %17 = vector.load %arg2[%c0_12, %c3, %c0_13] : memref<1x4x256xf32, #tpu.memory_space<vmem>>, vector<1x1x256xf32>
    %18 = vector.shape_cast %17 : vector<1x1x256xf32> to vector<1x256xf32>
    %c0_14 = arith.constant 0 : index
    %c3_15 = arith.constant 3 : index
    %19 = memref.load %arg3[%c0_14, %c3_15] : memref<3x4xf32, #tpu.memory_space<smem>>
    %20 = vector.broadcast %19 : f32 to vector<1x256xf32>
    %21 = arith.mulf %18, %20 : vector<1x256xf32>
    %22 = arith.addf %16, %21 : vector<1x256xf32>
    %c0_16 = arith.constant 0 : index
    %23 = memref.load %arg4[%c0_16] : memref<3xf32, #tpu.memory_space<smem>>
    %24 = vector.broadcast %23 : f32 to vector<1x256xf32>
    %25 = arith.addf %22, %24 : vector<1x256xf32>
    %c0_17 = arith.constant 0 : index
    %c0_18 = arith.constant 0 : index
    %c0_19 = arith.constant 0 : index
    %26 = vector.load %arg5[%c0_17, %c0_18, %c0_19] : memref<1x3x256xf32, #tpu.memory_space<vmem>>, vector<1x1x256xf32>
    %27 = vector.shape_cast %26 : vector<1x1x256xf32> to vector<1x256xf32>
    %28 = vector.shape_cast %25 : vector<1x256xf32> to vector<1x1x256xf32>
    tpu.vector_store %arg5[%c0_17, %c0_18, %c0_19], %28 {strides = array<i32>} : memref<1x3x256xf32, #tpu.memory_space<vmem>>, vector<1x1x256xf32>,
    %c0_20 = arith.constant 0 : index
    %c0_21 = arith.constant 0 : index
    %c0_22 = arith.constant 0 : index
    %29 = vector.load %arg2[%c0_20, %c0_21, %c0_22] : memref<1x4x256xf32, #tpu.memory_space<vmem>>, vector<1x1x256xf32>
    %30 = vector.shape_cast %29 : vector<1x1x256xf32> to vector<1x256xf32>
    %c1_23 = arith.constant 1 : index
    %c0_24 = arith.constant 0 : index
    %31 = memref.load %arg3[%c1_23, %c0_24] : memref<3x4xf32, #tpu.memory_space<smem>>
    %32 = vector.broadcast %31 : f32 to vector<1x256xf32>
    %33 = arith.mulf %30, %32 : vector<1x256xf32>
    %c0_25 = arith.constant 0 : index
    %c1_26 = arith.constant 1 : index
    %c0_27 = arith.constant 0 : index
    %34 = vector.load %arg2[%c0_25, %c1_26, %c0_27] : memref<1x4x256xf32, #tpu.memory_space<vmem>>, vector<1x1x256xf32>
    %35 = vector.shape_cast %34 : vector<1x1x256xf32> to vector<1x256xf32>
    %c1_28 = arith.constant 1 : index
    %c1_29 = arith.constant 1 : index
    %36 = memref.load %arg3[%c1_28, %c1_29] : memref<3x4xf32, #tpu.memory_space<smem>>
    %37 = vector.broadcast %36 : f32 to vector<1x256xf32>
    %38 = arith.mulf %35, %37 : vector<1x256xf32>
    %39 = arith.addf %33, %38 : vector<1x256xf32>
    %c0_30 = arith.constant 0 : index
    %c2_31 = arith.constant 2 : index
    %c0_32 = arith.constant 0 : index
    %40 = vector.load %arg2[%c0_30, %c2_31, %c0_32] : memref<1x4x256xf32, #tpu.memory_space<vmem>>, vector<1x1x256xf32>
    %41 = vector.shape_cast %40 : vector<1x1x256xf32> to vector<1x256xf32>
    %c1_33 = arith.constant 1 : index
    %c2_34 = arith.constant 2 : index
    %42 = memref.load %arg3[%c1_33, %c2_34] : memref<3x4xf32, #tpu.memory_space<smem>>
    %43 = vector.broadcast %42 : f32 to vector<1x256xf32>
    %44 = arith.mulf %41, %43 : vector<1x256xf32>
    %45 = arith.addf %39, %44 : vector<1x256xf32>
    %c0_35 = arith.constant 0 : index
    %c3_36 = arith.constant 3 : index
    %c0_37 = arith.constant 0 : index
    %46 = vector.load %arg2[%c0_35, %c3_36, %c0_37] : memref<1x4x256xf32, #tpu.memory_space<vmem>>, vector<1x1x256xf32>
    %47 = vector.shape_cast %46 : vector<1x1x256xf32> to vector<1x256xf32>
    %c1_38 = arith.constant 1 : index
    %c3_39 = arith.constant 3 : index
    %48 = memref.load %arg3[%c1_38, %c3_39] : memref<3x4xf32, #tpu.memory_space<smem>>
    %49 = vector.broadcast %48 : f32 to vector<1x256xf32>
    %50 = arith.mulf %47, %49 : vector<1x256xf32>
    %51 = arith.addf %45, %50 : vector<1x256xf32>
    %c1_40 = arith.constant 1 : index
    %52 = memref.load %arg4[%c1_40] : memref<3xf32, #tpu.memory_space<smem>>
    %53 = vector.broadcast %52 : f32 to vector<1x256xf32>
    %54 = arith.addf %51, %53 : vector<1x256xf32>
    %c0_41 = arith.constant 0 : index
    %c1_42 = arith.constant 1 : index
    %c0_43 = arith.constant 0 : index
    %55 = vector.load %arg5[%c0_41, %c1_42, %c0_43] : memref<1x3x256xf32, #tpu.memory_space<vmem>>, vector<1x1x256xf32>
    %56 = vector.shape_cast %55 : vector<1x1x256xf32> to vector<1x256xf32>
    %57 = vector.shape_cast %54 : vector<1x256xf32> to vector<1x1x256xf32>
    tpu.vector_store %arg5[%c0_41, %c1_42, %c0_43], %57 {strides = array<i32>} : memref<1x3x256xf32, #tpu.memory_space<vmem>>, vector<1x1x256xf32>,
    %c0_44 = arith.constant 0 : index
    %c0_45 = arith.constant 0 : index
    %c0_46 = arith.constant 0 : index
    %58 = vector.load %arg2[%c0_44, %c0_45, %c0_46] : memref<1x4x256xf32, #tpu.memory_space<vmem>>, vector<1x1x256xf32>
    %59 = vector.shape_cast %58 : vector<1x1x256xf32> to vector<1x256xf32>
    %c2_47 = arith.constant 2 : index
    %c0_48 = arith.constant 0 : index
    %60 = memref.load %arg3[%c2_47, %c0_48] : memref<3x4xf32, #tpu.memory_space<smem>>
    %61 = vector.broadcast %60 : f32 to vector<1x256xf32>
    %62 = arith.mulf %59, %61 : vector<1x256xf32>
    %c0_49 = arith.constant 0 : index
    %c1_50 = arith.constant 1 : index
    %c0_51 = arith.constant 0 : index
    %63 = vector.load %arg2[%c0_49, %c1_50, %c0_51] : memref<1x4x256xf32, #tpu.memory_space<vmem>>, vector<1x1x256xf32>
    %64 = vector.shape_cast %63 : vector<1x1x256xf32> to vector<1x256xf32>
    %c2_52 = arith.constant 2 : index
    %c1_53 = arith.constant 1 : index
    %65 = memref.load %arg3[%c2_52, %c1_53] : memref<3x4xf32, #tpu.memory_space<smem>>
    %66 = vector.broadcast %65 : f32 to vector<1x256xf32>
    %67 = arith.mulf %64, %66 : vector<1x256xf32>
    %68 = arith.addf %62, %67 : vector<1x256xf32>
    %c0_54 = arith.constant 0 : index
    %c2_55 = arith.constant 2 : index
    %c0_56 = arith.constant 0 : index
    %69 = vector.load %arg2[%c0_54, %c2_55, %c0_56] : memref<1x4x256xf32, #tpu.memory_space<vmem>>, vector<1x1x256xf32>
    %70 = vector.shape_cast %69 : vector<1x1x256xf32> to vector<1x256xf32>
    %c2_57 = arith.constant 2 : index
    %c2_58 = arith.constant 2 : index
    %71 = memref.load %arg3[%c2_57, %c2_58] : memref<3x4xf32, #tpu.memory_space<smem>>
    %72 = vector.broadcast %71 : f32 to vector<1x256xf32>
    %73 = arith.mulf %70, %72 : vector<1x256xf32>
    %74 = arith.addf %68, %73 : vector<1x256xf32>
    %c0_59 = arith.constant 0 : index
    %c3_60 = arith.constant 3 : index
    %c0_61 = arith.constant 0 : index
    %75 = vector.load %arg2[%c0_59, %c3_60, %c0_61] : memref<1x4x256xf32, #tpu.memory_space<vmem>>, vector<1x1x256xf32>
    %76 = vector.shape_cast %75 : vector<1x1x256xf32> to vector<1x256xf32>
    %c2_62 = arith.constant 2 : index
    %c3_63 = arith.constant 3 : index
    %77 = memref.load %arg3[%c2_62, %c3_63] : memref<3x4xf32, #tpu.memory_space<smem>>
    %78 = vector.broadcast %77 : f32 to vector<1x256xf32>
    %79 = arith.mulf %76, %78 : vector<1x256xf32>
    %80 = arith.addf %74, %79 : vector<1x256xf32>
    %c2_64 = arith.constant 2 : index
    %81 = memref.load %arg4[%c2_64] : memref<3xf32, #tpu.memory_space<smem>>
    %82 = vector.broadcast %81 : f32 to vector<1x256xf32>
    %83 = arith.addf %80, %82 : vector<1x256xf32>
    %c0_65 = arith.constant 0 : index
    %c2_66 = arith.constant 2 : index
    %c0_67 = arith.constant 0 : index
    %84 = vector.load %arg5[%c0_65, %c2_66, %c0_67] : memref<1x3x256xf32, #tpu.memory_space<vmem>>, vector<1x1x256xf32>
    %85 = vector.shape_cast %84 : vector<1x1x256xf32> to vector<1x256xf32>
    %86 = vector.shape_cast %83 : vector<1x256xf32> to vector<1x1x256xf32>
    tpu.vector_store %arg5[%c0_65, %c2_66, %c0_67], %86 {strides = array<i32>} : memref<1x3x256xf32, #tpu.memory_space<vmem>>, vector<1x1x256xf32>,
    return
  }
  func.func @transform_0(%arg0: i32, %arg1: i32) -> (i32, i32, i32) {
    %c0_i32 = arith.constant 0 : i32
    %c0_i32_0 = arith.constant 0 : i32
    return %arg0, %c0_i32, %arg1 : i32, i32, i32
  }
  func.func @transform_1(%arg0: i32, %arg1: i32) -> (i32, i32) {
    %c0_i32 = arith.constant 0 : i32
    %c0_i32_0 = arith.constant 0 : i32
    %c0_i32_1 = arith.constant 0 : i32
    return %c0_i32, %c0_i32_0 : i32, i32
  }
  func.func @transform_2(%arg0: i32, %arg1: i32) -> i32 {
    %c0_i32 = arith.constant 0 : i32
    %c0_i32_0 = arith.constant 0 : i32
    return %c0_i32 : i32
  }
  func.func @transform_3(%arg0: i32, %arg1: i32) -> (i32, i32, i32) {
    %c0_i32 = arith.constant 0 : i32
    %c0_i32_0 = arith.constant 0 : i32
    return %arg0, %c0_i32, %arg1 : i32, i32, i32
  }
}

</mosaic_0001>

<bundles_post_ra>
// kernel: tpu_custom_call.1
= control target key start
LH: loop header
LB: loop body
LE: loop exit
PB: predicated region body
PF: predicated region fallthrough
CT: control target
= control target key end

     0   :  { %8 = vsyncpa [#allocation3], 0  ;;  %s865_s0 = inlined_call_operand.hbm [shape: f32[2,4,256], index: 0, kind: input, shape index: {}]   ;;  %s866_s1 = inlined_call_operand.hbm [shape: f32[3,4], index: 1, kind: input, shape index: {}]   ;;  %s867_s2 = inlined_call_operand.vmem [shape: f32[3], index: 2, kind: input, shape index: {}]   ;;  %s868_s3 = inlined_call_operand.vmem [shape: f32[2,3,256], index: 3, kind: output, shape index: {}]  }
   0x1   :  { %10 = vsyncpa [#allocation3 + $0x1], 0 }
   0x2   :  { %11 = vsyncpa [#allocation4], 0 }
   0x3   :  { %12 = vsyncpa [#allocation5], 0  ;;  %s704_s12 = smov 0   ;;  %s706_s13 = smov 0  }
   0x4   :  { %s708_s14 = smov 0   ;;  %s710_s15 = smov 0  }
   0x5   :  { %s712_s16 = smov 0   ;;  %s714_s17 = smov 0  }
   0x6 LB: > { %s443_s18 = sadd.s32 4294967295, %s680_s17   ;;  %p52_p0 = scmp.ne.s32.totalorder %s664_s13, %s660_s12  ;;  %s680_s17 = sphi %s714_s17, %s18_s17   ;;  %s676_s16 = sphi %s712_s16, %s879_s16   ;;  %s672_s15 = sphi %s710_s15, %s878_s15   ;;  %s668_s14 = sphi %s708_s14, %s877_s14   ;;  %s664_s13 = sphi %s706_s13, %s876_s13   ;;  %s660_s12 = sphi %s704_s12, %s875_s12  }
   0x7   : > { %p734_p1 = scmp.eq.s32.totalorder %s443_s18, 0  ;;  %p445_p2 = scmp.ge.s32.totalorder %s680_s17, 1 }
   0x8   : > { %p133_p3 = scmp.lt.s32.totalorder %s680_s17, 3  ;;  %s145_s23 = sshll.u32 %s866_s1, 4  ;;  %s146_s23 = int_to_ptr.hbm [resolvable:$true] %s145_s23 }
   0x9   : > { %p742_p4 = por %p734_p1, %p52_p0  ;;  %s155_s27 = sshll.u32 %s867_s2, 4  ;;  %s156_s27 = int_to_ptr.vmem [resolvable:$true] %s155_s27 }
   0xa   : > { %p749_p5 = pnand %p445_p2, %p133_p3  ;;  %s682_s28 = smov [#allocation6]  }
   0xb   : > { %s683_s29 = smov [#allocation7]   ;;  %s30_s30 = sadd.s32 1, %s676_s16 }
   0xc   : > { %p496_p6 = pneg %p749_p5  ;;  %s39_s4 = sadd.s32 1, %s668_s14 }
   0xd   : > { %p32_p8 = scmp.ge.s32.totalorder %s30_s30, 2  ;;  %p46_p9 = scmp.ne.s32.totalorder %s668_s14, %s664_s13 }
   0xe   : > { %p497_p7 = pnand %p496_p6, %p734_p1  ;;  %p47_p10 = scmp.eq.s32.totalorder %s680_s17, 0 }
   0xf   : > { %p509_p11 = scmp.lt.s32.totalorder %s680_s17, 2  ;;  %s881_s30 = smov (%p32_p8, %s30_s30), 0 }
  0x10   : > { %499 = dma.hbm_to_smem (!%p497_p7), %s146_s23, 64, %s682_s28, [#allocation4]  }
  0x11   : > { %502 = dma.vmem_to_smem (!%p497_p7), %s156_s27, 16, %s683_s29, [#allocation5]  }
  0x12   : > { %p768_p12 = por %p47_p10, %p46_p9  ;;  %s166_s6 = sand.u32 1, %s668_s14  }
  0x13   : > { %s34_s7 = ssub.s32 %s676_s16, %s881_s30  ;;  %s449_s8 = sshll.u32 %s166_s6, 3 }
  0x14   : > { %p37_p13 = scmp.eq.s32.totalorder %s34_s7, 0  ;;  %s484_s9 = sshll.u32 %s676_s16, 3 }
  0x15   : > { %s177_s18 = scalar_lea.hbm %s865_s0, %s484_s9  ;;  %s170_s21 = scalar_lea.vmem [#allocation2], %s449_s8 }
  0x16   : > { %s777_s10 = scalar_select %p37_p13, %s668_s14, %s39_s4  }
  0x17   : > { %s181_s22 = sshll.u32 %s170_s21, 4  ;;  %s179_s23 = sshll.u32 %s177_s18, 4  ;;  %s182_s22 = int_to_ptr.vmem [resolvable:$true] %s181_s22  ;;  %s180_s23 = int_to_ptr.hbm [resolvable:$true] %s179_s23 }
  0x18   : > { %p504_p0 = pnand %p509_p11, %p768_p12  ;;  %s167_s25 = scalar_lea.sflag [#allocation3], %s166_s6 }
  0x19   : > { %190 = sbr.rel (%p749_p5) target bundleno = 66 (0x42), region = 32  ;;  %s192_s26 = sand.u32 (!%p749_p5), 1, %s664_s13  }
  0x1a   : > { %506 = dma.hbm_to_vmem [thread:$0]  (!%p504_p0), %s180_s23, 128, %s182_s22, %s167_s25  }
  0x1b   : > { %s453_s27 = sshll.u32 (!%p749_p5), %s192_s26, 3  ;;  %s193_s28 = scalar_lea.sflag (!%p749_p5), [#allocation3], %s192_s26 }
  0x1c   : > { %s789_s29 = scalar_lea.vmem (!%p749_p5), [#allocation2], %s453_s27 }
  0x1e   : > { %647 = dma.done.wait (%p742_p4), %s193_s28, 128  }
  0x1f   : > { %649 = vsyncadd (%p742_p4), %s193_s28, 4294967168 }
  0x20   : > { %651 = dma.done.wait (%p734_p1), [#allocation4], 64  }
  0x21   : > { %653 = vsyncadd (%p734_p1), [#allocation4], 4294967232 }
  0x22   : > { %655 = dma.done.wait (%p734_p1), [#allocation5], 16  }
  0x23   : > { %657 = vsyncadd (%p734_p1), [#allocation5], 4294967280 }
  0x24   : > { %212 = sfence }
  0x25   : > { %p237_p2 = scmp.lt.s32.totalorder %s672_s15, 1  ;;  %s247_s20 = sld [smem:[#allocation6]]  ;;  %v246_v0 = vld [vmem:[%s789_s29] ss:$4 sm:$0x3]  ;;  %v271_v14 = vlaneseq }
  0x26   : > { %s459_s24 = sld [smem:[#allocation6 + $0x1]]  ;;  %v458_v1 = vld [vmem:[%s789_s29 + $0x1] ss:$4 sm:$0x3] }
  0x27   : > { %s883_s15 = smov (!%p237_p2, %s672_s15), 1  ;;  %s461_s4 = sld [smem:[#allocation6 + $0x2]]  ;;  %v460_v5 = vld [vmem:[%s789_s29 + $0x2] ss:$4 sm:$0x3]  ;;  %vm828_vm0 = vcmp.lt.s32.totalorder %v271_v14, 256 }
  0x28   : > { %s463_s5 = sld [smem:[#allocation6 + $0x3]]  ;;  %v462_v7 = vld [vmem:[%s789_s29 + $0x3] ss:$4 sm:$0x3]  ;;  %s485_s18 = sshll.u32 %s883_s15, 3 }
  0x29   : > { %s809_s6 = sld [smem:[#allocation7]]  ;;  %v276_v12 = vld [vmem:[%s789_s29] ss:$4 sm:$0x3]  ;;  %s826_s15 = scalar_lea.vmem %s868_s3, %s485_s18 }
  0x2a   : > { %s464_s19 = sld [smem:[#allocation6 + $0x80]]  ;;  %v465_v15 = vld [vmem:[%s789_s29 + $0x1] ss:$4 sm:$0x3] }
  0x2b   : > { %v248_v2 = vstv %s247_s20  ;;  %s466_s7 = sld [smem:[#allocation6 + $0x81]]  ;;  %v467_v18 = vld [vmem:[%s789_s29 + $0x2] ss:$4 sm:$0x3] }
  0x2c   : > { %v249_v3 = vmul.f32 %v248_v2, %v246_v0  ;;  %v253_v4 = vstv %s459_s24  ;;  %s468_s8 = sld [smem:[#allocation6 + $0x82]]  ;;  %v469_v22 = vld [vmem:[%s789_s29 + $0x3] ss:$4 sm:$0x3] }
  0x2d   : > { %v254_v6 = vmul.f32 %v458_v1, %v253_v4  ;;  %v259_v8 = vstv %s461_s4  ;;  %s813_s9 = sld [smem:[#allocation6 + $0x83]]  ;;  %v300_v29 = vld [vmem:[%s789_s29] ss:$4 sm:$0x3] }
  0x2e   : > { %v260_v10 = vmul.f32 %v460_v5, %v259_v8  ;;  %v265_v11 = vstv %s463_s5  ;;  %s816_s11 = sld [smem:[#allocation7 + $0x1]]  ;;  %v474_v33 = vld [vmem:[%s789_s29 + $0x1] ss:$4 sm:$0x3] }
  0x2f   : > { %v255_v9 = vadd.f32 %v254_v6, %v249_v3  ;;  %v266_v13 = vmul.f32 %v462_v7, %v265_v11  ;;  %s473_s12 = sld [smem:[#allocation6 + $0x100]]  ;;  %v269_v19 = vstv %s809_s6  ;;  %v476_v35 = vld [vmem:[%s789_s29 + $0x2] ss:$4 sm:$0x3] }
  0x30   : > { %v278_v17 = vstv %s464_s19  ;;  %s475_s21 = sld [smem:[#allocation6 + $0x101]]  ;;  %v478_v39 = vld [vmem:[%s789_s29 + $0x3] ss:$4 sm:$0x3] }
  0x31   : > { %v261_v16 = vadd.f32 %v260_v10, %v255_v9  ;;  %v279_v20 = vmul.f32 %v278_v17, %v276_v12  ;;  %v282_v21 = vstv %s466_s7  ;;  %s477_s22 = sld [smem:[#allocation6 + $0x102]] }
  0x32   : > { %v283_v24 = vmul.f32 %v465_v15, %v282_v21  ;;  %v287_v25 = vstv %s468_s8  ;;  %s479_s23 = sld [smem:[#allocation6 + $0x103]] }
  0x33   : > { %v267_v23 = vadd.f32 %v266_v13, %v261_v16  ;;  %v288_v27 = vmul.f32 %v467_v18, %v287_v25  ;;  %v292_v28 = vstv %s813_s9  ;;  %s480_s27 = sld [smem:[#allocation7 + $0x2]] }
  0x34   : > { %v284_v31 = vadd.f32 %v283_v24, %v279_v20  ;;  %v293_v32 = vmul.f32 %v469_v22, %v292_v28  ;;  %v296_v40 = vstv %s816_s11 }
  0x35   : > { %v270_v30 = vadd.f32 %v269_v19, %v267_v23  ;;  %v302_v34 = vstv %s473_s12 }
  0x36   : > { %v289_v36 = vadd.f32 %v288_v27, %v284_v31  ;;  %v303_v37 = vmul.f32 %v302_v34, %v300_v29  ;;  %v306_v38 = vstv %s475_s21 }
  0x37   : > { %275 = vst.msk [vmem:[%s826_s15] ss:$4 sm:$0x3] %vm828_vm0, %v270_v30  ;;  %v307_v41 = vmul.f32 %v474_v33, %v306_v38  ;;  %v311_v42 = vstv %s477_s22 }
  0x38   : > { %v294_v43 = vadd.f32 %v293_v32, %v289_v36  ;;  %v312_v44 = vmul.f32 %v476_v35, %v311_v42  ;;  %v316_v45 = vstv %s479_s23 }
  0x39   : > { %v308_v46 = vadd.f32 %v307_v41, %v303_v37  ;;  %v317_v47 = vmul.f32 %v478_v39, %v316_v45  ;;  %v320_v50 = vstv %s480_s27 }
  0x3a   : > { %v297_v48 = vadd.f32 %v296_v40, %v294_v43 }
  0x3b   : > { %v313_v49 = vadd.f32 %v312_v44, %v308_v46 }
  0x3c   : > { %472 = vst.msk [vmem:[%s826_s15 + $0x1] ss:$4 sm:$0x3] %vm828_vm0, %v297_v48 }
  0x3d   : > { %v318_v51 = vadd.f32 %v317_v47, %v313_v49 }
  0x3f   : > { %v321_v52 = vadd.f32 %v320_v50, %v318_v51 }
  0x41   : > { %481 = vst.msk [vmem:[%s826_s15 + $0x2] ss:$4 sm:$0x3] %vm828_vm0, %v321_v52 }
  0x42 PF: > { %s18_s17 = sadd.s32 1, %s680_s17   ;;  %s875_s12 = smov %s664_s13 }
  0x43   : > { %p15_p1 = scmp.ge.s32.totalorder %s18_s17, 4   ;;  %s876_s13 = smov %s668_s14 }
  0x44   : > { %s877_s14 = smov %s777_s10  ;;  %s878_s15 = smov %s676_s16 }
  0x45   : > { %s879_s16 = smov %s881_s30  ;;  %17 = sbr.rel (!%p15_p1) target bundleno = 6 (0x6), region = 87 }
  0x4a   :  { %354 = vsyncpa [#allocation3], 1 }
  0x4b   :  { %356 = vsyncpa [#allocation3 + $0x1], 1 }
  0x4c   :  { %357 = vsyncpa [#allocation4], 1 }
  0x4d   :  { %359 = vsyncpa [#allocation4 + $0x1], 1 }
  0x4e   :  { %360 = vsyncpa [#allocation5], 1 }
  0x4f   :  { %362 = vsyncpa [#allocation5 + $0x1], 1 }

</bundles_post_ra>
